<compile_context>
chip_gen: v7x
topology: tpu7x:2x2x1
jax: 0.10.0
libtpu: 0.0.40
codegen_flags: <defaults>
</compile_context>

<pallas_src>
import functools

import jax
import jax.numpy as jnp
from jax import lax
from jax.experimental import pallas as pl
from jax.experimental.pallas import tpu as pltpu


def _round_up(x, m):
    return -(-x // m) * m


def _lifted_structure_kernel(x_blk_ref, x_col_ref, tcol_ref, trow_ref, out_ref,
                             acc_pos, acc_neg, acc_stats,
                             *, n, tm, tn, pos_margin, last_tile,
                             last_row_in_tile):
    i = pl.program_id(0)   # row-tile index ("parallel")
    k = pl.program_id(1)   # column-tile index ("arbitrary" reduction axis)

    @pl.when(k == 0)
    def _init():
        acc_pos[...] = jnp.zeros_like(acc_pos)
        acc_neg[...] = jnp.zeros_like(acc_neg)
        acc_stats[...] = jnp.zeros_like(acc_stats)

    # (TM, TN) similarity block on the MXU.  Inputs arrive pre-cast (bf16 by
    # default); contract the last dim of both operands so no transpose of X is
    # ever materialized.  Accumulate in f32.
    sim = lax.dot_general(
        x_blk_ref[...], x_col_ref[...],
        dimension_numbers=(((1,), (1,)), ((), ())),
        preferred_element_type=jnp.float32)

    t_col = tcol_ref[...]                                           # (TM, 1) i32
    t_row = trow_ref[...]                                           # (1, TN) i32

    col_idx = k * tn + lax.broadcasted_iota(jnp.int32, (1, tn), 1)
    col_valid = col_idx < n                                         # mask padded cols

    same = t_col == t_row                                           # (TM, TN)
    pos_mask = same & col_valid & (sim < pos_margin)
    neg_mask = jnp.logical_not(same) & col_valid

    # Single exp over the disjoint masks: pos entries use exp(1 - sim) (the
    # torch code hard-codes 1.0 regardless of pos_margin), neg entries exp(sim).
    e = jnp.exp(jnp.where(same, 1.0 - sim, sim))

    acc_pos[...] += jnp.sum(jnp.where(pos_mask, e, 0.0), axis=1, keepdims=True)
    acc_neg[...] += jnp.sum(jnp.where(neg_mask, e, 0.0), axis=1, keepdims=True)

    # Last-row statistics: only the single tile holding global row n-1 does any
    # work here, and only on one (1, TN) row slice of the block.
    @pl.when(i == last_tile)
    def _stats():
        r = last_row_in_tile                                        # static int
        sim_row = sim[r:r + 1, :]                                   # (1, TN)
        pos_row = pos_mask[r:r + 1, :]
        neg_row = neg_mask[r:r + 1, :]
        pls = jnp.sum(jnp.where(pos_row, sim_row, 0.0), axis=1, keepdims=True)
        plc = jnp.sum(jnp.where(pos_row, 1.0, 0.0), axis=1, keepdims=True)
        nls = jnp.sum(jnp.where(neg_row, sim_row, 0.0), axis=1, keepdims=True)
        nlc = jnp.sum(jnp.where(neg_row, 1.0, 0.0), axis=1, keepdims=True)
        lane = lax.broadcasted_iota(jnp.int32, (1, 128), 1)
        upd = jnp.where(lane == 2, pls, 0.0)
        upd = jnp.where(lane == 3, plc, upd)
        upd = jnp.where(lane == 4, nls, upd)
        upd = jnp.where(lane == 5, nlc, upd)
        acc_stats[...] += upd

    # Finalize this row tile after the last column block and pack everything
    # into one lane-dense (8, 128) output block (row 0 only):
    #   lane 0: loss partial, lane 1: skip count, lanes 2-5: last-row stats.
    @pl.when(k == pl.num_programs(1) - 1)
    def _finalize():
        pos_sum = acc_pos[...]                                      # (TM, 1)
        neg_sum = acc_neg[...]
        row_idx = i * tm + lax.broadcasted_iota(jnp.int32, (tm, 1), 0)
        row_valid = row_idx < n
        # exp(.) > 0, so the sum is > 0 iff the neg set is non-empty (cheaper
        # than a dense any(); differs only if every exp(neg) underflows).
        has_neg = neg_sum > 0.0
        per_row = jnp.where(has_neg & row_valid,
                            jnp.log(pos_sum) + jnp.log(neg_sum), 0.0)
        loss_p = jnp.sum(per_row, axis=0, keepdims=True)            # (1, 1)
        skip_p = jnp.sum(jnp.where(jnp.logical_not(has_neg) & row_valid,
                                   1.0, 0.0), axis=0, keepdims=True)

        lane = lax.broadcasted_iota(jnp.int32, (1, 128), 1)
        stats = acc_stats[...]                                      # (1, 128)
        stats = jnp.where(lane == 0, loss_p, stats)
        stats = jnp.where(lane == 1, skip_p, stats)
        sub = lax.broadcasted_iota(jnp.int32, (8, 128), 0)
        out_ref[...] = jnp.where(sub == 0,
                                 jnp.broadcast_to(stats, (8, 128)), 0.0)


def lifted_structure_loss(inputs, targets, nonorm=None, *, pos_margin=1.0,
                          matmul_dtype=jnp.bfloat16):
    """Returns (loss, prec, mean_pos_sim, mean_neg_sim) like the torch forward."""
    del nonorm  # unused in the reference forward
    n, d = inputs.shape

    n8 = _round_up(n, 8)
    if n8 <= 256:
        tm = n8
        # Split into two row tiles when cheaply possible so both v7x
        # TensorCores get work (neutral on single-TC v5e/v6e).  Keep tm a
        # multiple of 16 so bf16 (16, 128) tiling stays aligned.
        if n8 >= 64 and n8 % 32 == 0:
            tm = n8 // 2
        tn = n8                      # single full-width column block
        n_pad = n8
    else:
        tm = 256                     # matches the 256x256 MXU on v6e/v7x
        tn = 512                     # column streaming: VMEM O(TM*TN + TN*D)
        n_pad = _round_up(n8, 512)   # multiple of both tm and tn

    num_row_tiles = n_pad // tm
    num_col_tiles = n_pad // tn
    last_tile = (n - 1) // tm                 # static Python ints
    last_row_in_tile = (n - 1) - last_tile * tm

    x = jnp.asarray(inputs, jnp.float32)
    t = jnp.asarray(targets, jnp.int32)
    if n_pad != n:
        x = jnp.pad(x, ((0, n_pad - n), (0, 0)))
        t = jnp.pad(t, (0, n_pad - n))
    # Cast once in the wrapper (bf16 default: native MXU rate + half the
    # DMA/VMEM).  Pass matmul_dtype=jnp.float32 for bit-faithful similarities.
    x_mm = x.astype(matmul_dtype)
    t_col = t.reshape(n_pad, 1)
    t_row = t.reshape(1, n_pad)

    kernel = functools.partial(
        _lifted_structure_kernel, n=n, tm=tm, tn=tn,
        pos_margin=float(pos_margin), last_tile=last_tile,
        last_row_in_tile=last_row_in_tile)

    # Explicit VMEM budget: double-buffered X blocks + labels + output +
    # scratch + generous headroom for the (TM, TN) sim/exp/mask temporaries.
    xb = jnp.dtype(matmul_dtype).itemsize
    vmem_est = (2 * tm * d * xb          # row stripe (double-buffered)
                + 2 * tn * d * xb        # streamed column block
                + 2 * (tm + tn) * 4      # label blocks
                + 2 * 8 * 128 * 4        # output block
                + (2 * tm + 128) * 4     # scratch accumulators
                + 8 * tm * tn * 4)       # sim / exp / mask temporaries
    vmem_limit = int(min(max(2 * vmem_est, 32 << 20), 64 << 20))

    out = pl.pallas_call(
        kernel,
        out_shape=jax.ShapeDtypeStruct((num_row_tiles * 8, 128), jnp.float32),
        grid=(num_row_tiles, num_col_tiles),
        in_specs=[
            pl.BlockSpec((tm, d), lambda i, k: (i, 0)),    # row stripe of X
            pl.BlockSpec((tn, d), lambda i, k: (k, 0)),    # streamed column block
            pl.BlockSpec((tm, 1), lambda i, k: (i, 0)),    # labels as column
            pl.BlockSpec((1, tn), lambda i, k: (0, k)),    # labels as row
        ],
        out_specs=pl.BlockSpec((8, 128), lambda i, k: (i, 0)),
        scratch_shapes=[
            pltpu.VMEM((tm, 1), jnp.float32),    # sum exp(1 - pos) per row
            pltpu.VMEM((tm, 1), jnp.float32),    # sum exp(neg)     per row
            pltpu.VMEM((1, 128), jnp.float32),   # last-row stats (lanes 2..5)
        ],
        compiler_params=pltpu.CompilerParams(
            dimension_semantics=("parallel", "arbitrary"),
            vmem_limit_bytes=vmem_limit),
    )(x_mm, x_mm, t_col, t_row)

    totals = jnp.sum(out, axis=0)                          # (128,)
    loss = totals[0] / n
    prec = totals[1] / n
    mean_pos_sim = totals[2] / totals[3]   # NaN if the last row's pos set is empty
    mean_neg_sim = totals[4] / totals[5]   # NaN if the last row's neg set is empty
    return loss, prec, mean_pos_sim, mean_neg_sim


if __name__ == "__main__":
    key = jax.random.PRNGKey(0)
    n, d = 8, 32
    # Small-scale embeddings so the (intentionally unstabilized, torch-matching)
    # exp() stays well-behaved.
    inputs = jax.random.normal(key, (n, d), dtype=jnp.float32) / jnp.sqrt(d)
    targets = jnp.array([0, 0, 1, 1, 2, 2, 3, 3], dtype=jnp.int32)

    loss, prec, mps, mns = lifted_structure_loss(inputs, targets, nonorm=None)
    jax.block_until_ready((loss, prec, mps, mns))
    print("KERNEL_OK")
</pallas_src>

<mosaic_0001>
module attributes {stable_mosaic.version = 11 : i64} {
  func.func @_lifted_structure_kernel(%arg0: i32, %arg1: i32, %arg2: memref<8x32xbf16, #tpu.memory_space<vmem>>, %arg3: memref<8x32xbf16, #tpu.memory_space<vmem>>, %arg4: memref<8x1xi32, #tpu.memory_space<vmem>>, %arg5: memref<1x8xi32, #tpu.memory_space<vmem>>, %arg6: memref<8x128xf32, #tpu.memory_space<vmem>>, %arg7: memref<8x1xf32, #tpu.memory_space<vmem>>, %arg8: memref<8x1xf32, #tpu.memory_space<vmem>>, %arg9: memref<1x128xf32, #tpu.memory_space<vmem>>) attributes {dimension_semantics = [#tpu.dimension_semantics<parallel>, #tpu.dimension_semantics<arbitrary>], iteration_bounds = array<i64: 1, 1>, scalar_prefetch = 0 : i64, scratch_operands = 3 : i64, tpu.core_type = #tpu.core_type<tc>, window_params = [{transform_indices = @transform_0, window_bounds = array<i64: 8, 32>}, {transform_indices = @transform_1, window_bounds = array<i64: 8, 32>}, {transform_indices = @transform_2, window_bounds = array<i64: 8, 1>}, {transform_indices = @transform_3, window_bounds = array<i64: 1, 8>}, {transform_indices = @transform_4, window_bounds = array<i64: 8, 128>}]} {
    %c0_i32 = arith.constant 0 : i32
    %0 = arith.cmpi eq, %arg1, %c0_i32 : i32
    %1 = arith.extui %0 : i1 to i32
    %c0_i32_0 = arith.constant 0 : i32
    %2 = arith.cmpi ne, %1, %c0_i32_0 : i32
    scf.if %2 {
      %cst_28 = arith.constant 0.000000e+00 : f32
      %49 = vector.broadcast %cst_28 : f32 to vector<8x1xf32>
      %c0_29 = arith.constant 0 : index
      %c0_30 = arith.constant 0 : index
      %50 = vector.load %arg7[%c0_29, %c0_30] : memref<8x1xf32, #tpu.memory_space<vmem>>, vector<8x1xf32>
      tpu.vector_store %arg7[%c0_29, %c0_30], %49 {strides = array<i32>} : memref<8x1xf32, #tpu.memory_space<vmem>>, vector<8x1xf32>,
      %cst_31 = arith.constant 0.000000e+00 : f32
      %51 = vector.broadcast %cst_31 : f32 to vector<8x1xf32>
      %c0_32 = arith.constant 0 : index
      %c0_33 = arith.constant 0 : index
      %52 = vector.load %arg8[%c0_32, %c0_33] : memref<8x1xf32, #tpu.memory_space<vmem>>, vector<8x1xf32>
      tpu.vector_store %arg8[%c0_32, %c0_33], %51 {strides = array<i32>} : memref<8x1xf32, #tpu.memory_space<vmem>>, vector<8x1xf32>,
      %cst_34 = arith.constant 0.000000e+00 : f32
      %53 = vector.broadcast %cst_34 : f32 to vector<1x128xf32>
      %c0_35 = arith.constant 0 : index
      %c0_36 = arith.constant 0 : index
      %54 = vector.load %arg9[%c0_35, %c0_36] : memref<1x128xf32, #tpu.memory_space<vmem>>, vector<1x128xf32>
      tpu.vector_store %arg9[%c0_35, %c0_36], %53 {strides = array<i32>} : memref<1x128xf32, #tpu.memory_space<vmem>>, vector<1x128xf32>,
    } else {
    }
    %c0 = arith.constant 0 : index
    %c0_1 = arith.constant 0 : index
    %3 = vector.load %arg2[%c0, %c0_1] : memref<8x32xbf16, #tpu.memory_space<vmem>>, vector<8x32xbf16>
    %c0_2 = arith.constant 0 : index
    %c0_3 = arith.constant 0 : index
    %4 = vector.load %arg3[%c0_2, %c0_3] : memref<8x32xbf16, #tpu.memory_space<vmem>>, vector<8x32xbf16>
    %cst = arith.constant dense<0.000000e+00> : vector<8x8xf32>
    %5 = tpu.matmul %3, %4, %cst {dimension_numbers = #tpu.dot_dimension_numbers<[1], [1], [0], [0], [0, 0, 1, 0], [], []>} : vector<8x32xbf16>, vector<8x32xbf16>, vector<8x8xf32> -> vector<8x8xf32>
    %c0_4 = arith.constant 0 : index
    %c0_5 = arith.constant 0 : index
    %6 = vector.load %arg4[%c0_4, %c0_5] : memref<8x1xi32, #tpu.memory_space<vmem>>, vector<8x1xi32>
    %c0_6 = arith.constant 0 : index
    %c0_7 = arith.constant 0 : index
    %7 = vector.load %arg5[%c0_6, %c0_7] : memref<1x8xi32, #tpu.memory_space<vmem>>, vector<1x8xi32>
    %c8_i32 = arith.constant 8 : i32
    %8 = arith.muli %arg1, %c8_i32 : i32
    %9 = tpu.iota {dimensions = array<i32: 1>} : vector<1x8xi32>
    %10 = vector.broadcast %8 : i32 to vector<1x8xi32>
    %11 = arith.addi %10, %9 : vector<1x8xi32>
    %c8_i32_8 = arith.constant 8 : i32
    %12 = vector.broadcast %c8_i32_8 : i32 to vector<1x8xi32>
    %13 = arith.cmpi slt, %11, %12 : vector<1x8xi32>
    %14 = vector.broadcast %6 : vector<8x1xi32> to vector<8x8xi32>
    %15 = vector.broadcast %7 : vector<1x8xi32> to vector<8x8xi32>
    %16 = arith.cmpi eq, %14, %15 : vector<8x8xi32>
    %17 = vector.broadcast %13 : vector<1x8xi1> to vector<8x8xi1>
    %18 = arith.andi %16, %17 : vector<8x8xi1>
    %cst_9 = arith.constant 1.000000e+00 : f32
    %19 = vector.broadcast %cst_9 : f32 to vector<8x8xf32>
    %20 = arith.cmpf olt, %5, %19 : vector<8x8xf32>
    %21 = arith.andi %18, %20 : vector<8x8xi1>
    %cst_10 = arith.constant dense<true> : vector<8x8xi1>
    %22 = arith.xori %16, %cst_10 : vector<8x8xi1>
    %23 = vector.broadcast %13 : vector<1x8xi1> to vector<8x8xi1>
    %24 = arith.andi %22, %23 : vector<8x8xi1>
    %cst_11 = arith.constant 1.000000e+00 : f32
    %25 = vector.broadcast %cst_11 : f32 to vector<8x8xf32>
    %26 = arith.subf %25, %5 : vector<8x8xf32>
    %27 = arith.select %16, %26, %5 : vector<8x8xi1>, vector<8x8xf32>
    %28 = math.exp %27 : vector<8x8xf32>
    %c0_12 = arith.constant 0 : index
    %c0_13 = arith.constant 0 : index
    %29 = vector.load %arg7[%c0_12, %c0_13] : memref<8x1xf32, #tpu.memory_space<vmem>>, vector<8x1xf32>
    %cst_14 = arith.constant 0.000000e+00 : f32
    %30 = vector.broadcast %cst_14 : f32 to vector<8x8xf32>
    %31 = arith.select %21, %28, %30 : vector<8x8xi1>, vector<8x8xf32>
    %cst_15 = arith.constant dense<0.000000e+00> : vector<8xf32>
    %32 = vector.multi_reduction <add>, %31, %cst_15 [1] : vector<8x8xf32> to vector<8xf32>
    %33 = vector.shape_cast %32 : vector<8xf32> to vector<8x1xf32>
    %34 = arith.addf %29, %33 : vector<8x1xf32>
    %c0_16 = arith.constant 0 : index
    %c0_17 = arith.constant 0 : index
    %35 = vector.load %arg7[%c0_16, %c0_17] : memref<8x1xf32, #tpu.memory_space<vmem>>, vector<8x1xf32>
    tpu.vector_store %arg7[%c0_16, %c0_17], %34 {strides = array<i32>} : memref<8x1xf32, #tpu.memory_space<vmem>>, vector<8x1xf32>,
    %c0_18 = arith.constant 0 : index
    %c0_19 = arith.constant 0 : index
    %36 = vector.load %arg8[%c0_18, %c0_19] : memref<8x1xf32, #tpu.memory_space<vmem>>, vector<8x1xf32>
    %cst_20 = arith.constant 0.000000e+00 : f32
    %37 = vector.broadcast %cst_20 : f32 to vector<8x8xf32>
    %38 = arith.select %24, %28, %37 : vector<8x8xi1>, vector<8x8xf32>
    %cst_21 = arith.constant dense<0.000000e+00> : vector<8xf32>
    %39 = vector.multi_reduction <add>, %38, %cst_21 [1] : vector<8x8xf32> to vector<8xf32>
    %40 = vector.shape_cast %39 : vector<8xf32> to vector<8x1xf32>
    %41 = arith.addf %36, %40 : vector<8x1xf32>
    %c0_22 = arith.constant 0 : index
    %c0_23 = arith.constant 0 : index
    %42 = vector.load %arg8[%c0_22, %c0_23] : memref<8x1xf32, #tpu.memory_space<vmem>>, vector<8x1xf32>
    tpu.vector_store %arg8[%c0_22, %c0_23], %41 {strides = array<i32>} : memref<8x1xf32, #tpu.memory_space<vmem>>, vector<8x1xf32>,
    %c0_i32_24 = arith.constant 0 : i32
    %43 = arith.cmpi eq, %arg0, %c0_i32_24 : i32
    %44 = arith.extui %43 : i1 to i32
    %c0_i32_25 = arith.constant 0 : i32
    %45 = arith.cmpi ne, %44, %c0_i32_25 : i32
    scf.if %45 {
      %49 = vector.extract_strided_slice %5 {offsets = [7, 0], sizes = [1, 8], strides = [1, 1]} : vector<8x8xf32> to vector<1x8xf32>
      %50 = vector.extract_strided_slice %21 {offsets = [7, 0], sizes = [1, 8], strides = [1, 1]} : vector<8x8xi1> to vector<1x8xi1>
      %51 = vector.extract_strided_slice %24 {offsets = [7, 0], sizes = [1, 8], strides = [1, 1]} : vector<8x8xi1> to vector<1x8xi1>
      %cst_28 = arith.constant 0.000000e+00 : f32
      %52 = vector.broadcast %cst_28 : f32 to vector<1x8xf32>
      %53 = arith.select %50, %49, %52 : vector<1x8xi1>, vector<1x8xf32>
      %cst_29 = arith.constant dense<0.000000e+00> : vector<1xf32>
      %54 = vector.multi_reduction <add>, %53, %cst_29 [1] : vector<1x8xf32> to vector<1xf32>
      %55 = vector.shape_cast %54 : vector<1xf32> to vector<1x1xf32>
      %cst_30 = arith.constant 1.000000e+00 : f32
      %cst_31 = arith.constant 0.000000e+00 : f32
      %56 = vector.broadcast %cst_30 : f32 to vector<1x8xf32>
      %57 = vector.broadcast %cst_31 : f32 to vector<1x8xf32>
      %58 = arith.select %50, %56, %57 : vector<1x8xi1>, vector<1x8xf32>
      %cst_32 = arith.constant dense<0.000000e+00> : vector<1xf32>
      %59 = vector.multi_reduction <add>, %58, %cst_32 [1] : vector<1x8xf32> to vector<1xf32>
      %60 = vector.shape_cast %59 : vector<1xf32> to vector<1x1xf32>
      %cst_33 = arith.constant 0.000000e+00 : f32
      %61 = vector.broadcast %cst_33 : f32 to vector<1x8xf32>
      %62 = arith.select %51, %49, %61 : vector<1x8xi1>, vector<1x8xf32>
      %cst_34 = arith.constant dense<0.000000e+00> : vector<1xf32>
      %63 = vector.multi_reduction <add>, %62, %cst_34 [1] : vector<1x8xf32> to vector<1xf32>
      %64 = vector.shape_cast %63 : vector<1xf32> to vector<1x1xf32>
      %cst_35 = arith.constant 1.000000e+00 : f32
      %cst_36 = arith.constant 0.000000e+00 : f32
      %65 = vector.broadcast %cst_35 : f32 to vector<1x8xf32>
      %66 = vector.broadcast %cst_36 : f32 to vector<1x8xf32>
      %67 = arith.select %51, %65, %66 : vector<1x8xi1>, vector<1x8xf32>
      %cst_37 = arith.constant dense<0.000000e+00> : vector<1xf32>
      %68 = vector.multi_reduction <add>, %67, %cst_37 [1] : vector<1x8xf32> to vector<1xf32>
      %69 = vector.shape_cast %68 : vector<1xf32> to vector<1x1xf32>
      %70 = tpu.iota {dimensions = array<i32: 1>} : vector<1x128xi32>
      %c2_i32 = arith.constant 2 : i32
      %71 = vector.broadcast %c2_i32 : i32 to vector<1x128xi32>
      %72 = arith.cmpi eq, %70, %71 : vector<1x128xi32>
      %cst_38 = arith.constant 0.000000e+00 : f32
      %73 = vector.shape_cast %55 : vector<1x1xf32> to vector<1x1xf32>
      %74 = vector.broadcast %73 : vector<1x1xf32> to vector<1x128xf32>
      %75 = vector.broadcast %cst_38 : f32 to vector<1x128xf32>
      %76 = arith.select %72, %74, %75 : vector<1x128xi1>, vector<1x128xf32>
      %c3_i32 = arith.constant 3 : i32
      %77 = vector.broadcast %c3_i32 : i32 to vector<1x128xi32>
      %78 = arith.cmpi eq, %70, %77 : vector<1x128xi32>
      %79 = vector.shape_cast %60 : vector<1x1xf32> to vector<1x1xf32>
      %80 = vector.broadcast %79 : vector<1x1xf32> to vector<1x128xf32>
      %81 = arith.select %78, %80, %76 : vector<1x128xi1>, vector<1x128xf32>
      %c4_i32 = arith.constant 4 : i32
      %82 = vector.broadcast %c4_i32 : i32 to vector<1x128xi32>
      %83 = arith.cmpi eq, %70, %82 : vector<1x128xi32>
      %84 = vector.shape_cast %64 : vector<1x1xf32> to vector<1x1xf32>
      %85 = vector.broadcast %84 : vector<1x1xf32> to vector<1x128xf32>
      %86 = arith.select %83, %85, %81 : vector<1x128xi1>, vector<1x128xf32>
      %c5_i32 = arith.constant 5 : i32
      %87 = vector.broadcast %c5_i32 : i32 to vector<1x128xi32>
      %88 = arith.cmpi eq, %70, %87 : vector<1x128xi32>
      %89 = vector.shape_cast %69 : vector<1x1xf32> to vector<1x1xf32>
      %90 = vector.broadcast %89 : vector<1x1xf32> to vector<1x128xf32>
      %91 = arith.select %88, %90, %86 : vector<1x128xi1>, vector<1x128xf32>
      %c0_39 = arith.constant 0 : index
      %c0_40 = arith.constant 0 : index
      %92 = vector.load %arg9[%c0_39, %c0_40] : memref<1x128xf32, #tpu.memory_space<vmem>>, vector<1x128xf32>
      %93 = arith.addf %92, %91 : vector<1x128xf32>
      %c0_41 = arith.constant 0 : index
      %c0_42 = arith.constant 0 : index
      %94 = vector.load %arg9[%c0_41, %c0_42] : memref<1x128xf32, #tpu.memory_space<vmem>>, vector<1x128xf32>
      tpu.vector_store %arg9[%c0_41, %c0_42], %93 {strides = array<i32>} : memref<1x128xf32, #tpu.memory_space<vmem>>, vector<1x128xf32>,
    } else {
    }
    %c0_i32_26 = arith.constant 0 : i32
    %46 = arith.cmpi eq, %arg1, %c0_i32_26 : i32
    %47 = arith.extui %46 : i1 to i32
    %c0_i32_27 = arith.constant 0 : i32
    %48 = arith.cmpi ne, %47, %c0_i32_27 : i32
    scf.if %48 {
      %c0_28 = arith.constant 0 : index
      %c0_29 = arith.constant 0 : index
      %49 = vector.load %arg7[%c0_28, %c0_29] : memref<8x1xf32, #tpu.memory_space<vmem>>, vector<8x1xf32>
      %c0_30 = arith.constant 0 : index
      %c0_31 = arith.constant 0 : index
      %50 = vector.load %arg8[%c0_30, %c0_31] : memref<8x1xf32, #tpu.memory_space<vmem>>, vector<8x1xf32>
      %c8_i32_32 = arith.constant 8 : i32
      %51 = arith.muli %arg0, %c8_i32_32 : i32
      %52 = tpu.iota {dimensions = array<i32: 0>} : vector<8x1xi32>
      %53 = vector.broadcast %51 : i32 to vector<8x1xi32>
      %54 = arith.addi %53, %52 : vector<8x1xi32>
      %c8_i32_33 = arith.constant 8 : i32
      %55 = vector.broadcast %c8_i32_33 : i32 to vector<8x1xi32>
      %56 = arith.cmpi slt, %54, %55 : vector<8x1xi32>
      %cst_34 = arith.constant 0.000000e+00 : f32
      %57 = vector.broadcast %cst_34 : f32 to vector<8x1xf32>
      %58 = arith.cmpf ogt, %50, %57 : vector<8x1xf32>
      %59 = arith.andi %58, %56 : vector<8x1xi1>
      %60 = math.log %49 : vector<8x1xf32>
      %61 = math.log %50 : vector<8x1xf32>
      %62 = arith.addf %60, %61 : vector<8x1xf32>
      %cst_35 = arith.constant 0.000000e+00 : f32
      %63 = vector.broadcast %cst_35 : f32 to vector<8x1xf32>
      %64 = arith.select %59, %62, %63 : vector<8x1xi1>, vector<8x1xf32>
      %cst_36 = arith.constant dense<0.000000e+00> : vector<1xf32>
      %65 = vector.multi_reduction <add>, %64, %cst_36 [0] : vector<8x1xf32> to vector<1xf32>
      %66 = vector.shape_cast %65 : vector<1xf32> to vector<1x1xf32>
      %cst_37 = arith.constant dense<true> : vector<8x1xi1>
      %67 = arith.xori %58, %cst_37 : vector<8x1xi1>
      %68 = arith.andi %67, %56 : vector<8x1xi1>
      %cst_38 = arith.constant 1.000000e+00 : f32
      %cst_39 = arith.constant 0.000000e+00 : f32
      %69 = vector.broadcast %cst_38 : f32 to vector<8x1xf32>
      %70 = vector.broadcast %cst_39 : f32 to vector<8x1xf32>
      %71 = arith.select %68, %69, %70 : vector<8x1xi1>, vector<8x1xf32>
      %cst_40 = arith.constant dense<0.000000e+00> : vector<1xf32>
      %72 = vector.multi_reduction <add>, %71, %cst_40 [0] : vector<8x1xf32> to vector<1xf32>
      %73 = vector.shape_cast %72 : vector<1xf32> to vector<1x1xf32>
      %74 = tpu.iota {dimensions = array<i32: 1>} : vector<1x128xi32>
      %c0_41 = arith.constant 0 : index
      %c0_42 = arith.constant 0 : index
      %75 = vector.load %arg9[%c0_41, %c0_42] : memref<1x128xf32, #tpu.memory_space<vmem>>, vector<1x128xf32>
      %c0_i32_43 = arith.constant 0 : i32
      %76 = vector.broadcast %c0_i32_43 : i32 to vector<1x128xi32>
      %77 = arith.cmpi eq, %74, %76 : vector<1x128xi32>
      %78 = vector.shape_cast %66 : vector<1x1xf32> to vector<1x1xf32>
      %79 = vector.broadcast %78 : vector<1x1xf32> to vector<1x128xf32>
      %80 = arith.select %77, %79, %75 : vector<1x128xi1>, vector<1x128xf32>
      %c1_i32 = arith.constant 1 : i32
      %81 = vector.broadcast %c1_i32 : i32 to vector<1x128xi32>
      %82 = arith.cmpi eq, %74, %81 : vector<1x128xi32>
      %83 = vector.shape_cast %73 : vector<1x1xf32> to vector<1x1xf32>
      %84 = vector.broadcast %83 : vector<1x1xf32> to vector<1x128xf32>
      %85 = arith.select %82, %84, %80 : vector<1x128xi1>, vector<1x128xf32>
      %86 = tpu.iota {dimensions = array<i32: 0>} : vector<8x128xi32>
      %c0_i32_44 = arith.constant 0 : i32
      %87 = vector.broadcast %c0_i32_44 : i32 to vector<8x128xi32>
      %88 = arith.cmpi eq, %86, %87 : vector<8x128xi32>
      %89 = vector.shape_cast %85 : vector<1x128xf32> to vector<1x128xf32>
      %90 = vector.broadcast %89 : vector<1x128xf32> to vector<8x128xf32>
      %cst_45 = arith.constant 0.000000e+00 : f32
      %91 = vector.broadcast %cst_45 : f32 to vector<8x128xf32>
      %92 = arith.select %88, %90, %91 : vector<8x128xi1>, vector<8x128xf32>
      %c0_46 = arith.constant 0 : index
      %c0_47 = arith.constant 0 : index
      %93 = vector.load %arg6[%c0_46, %c0_47] : memref<8x128xf32, #tpu.memory_space<vmem>>, vector<8x128xf32>
      tpu.vector_store %arg6[%c0_46, %c0_47], %92 {strides = array<i32>} : memref<8x128xf32, #tpu.memory_space<vmem>>, vector<8x128xf32>,
    } else {
    }
    return
  }
  func.func @transform_0(%arg0: i32, %arg1: i32) -> (i32, i32) {
    %c0_i32 = arith.constant 0 : i32
    %c0_i32_0 = arith.constant 0 : i32
    return %arg0, %c0_i32 : i32, i32
  }
  func.func @transform_1(%arg0: i32, %arg1: i32) -> (i32, i32) {
    %c0_i32 = arith.constant 0 : i32
    %c0_i32_0 = arith.constant 0 : i32
    return %arg1, %c0_i32 : i32, i32
  }
  func.func @transform_2(%arg0: i32, %arg1: i32) -> (i32, i32) {
    %c0_i32 = arith.constant 0 : i32
    %c0_i32_0 = arith.constant 0 : i32
    return %arg0, %c0_i32 : i32, i32
  }
  func.func @transform_3(%arg0: i32, %arg1: i32) -> (i32, i32) {
    %c0_i32 = arith.constant 0 : i32
    %c0_i32_0 = arith.constant 0 : i32
    return %c0_i32, %arg1 : i32, i32
  }
  func.func @transform_4(%arg0: i32, %arg1: i32) -> (i32, i32) {
    %c0_i32 = arith.constant 0 : i32
    %c0_i32_0 = arith.constant 0 : i32
    return %arg0, %c0_i32 : i32, i32
  }
}

</mosaic_0001>

<bundles_post_ra>
// kernel: tpu_custom_call.1
= control target key start
LH: loop header
LB: loop body
LE: loop exit
PB: predicated region body
PF: predicated region fallthrough
CT: control target
= control target key end

     0   :  { %vm29_vm0 = vcmask 261120   ;;  %v290_v1 = vmov 0.0   ;;  %vm291_vm1 = vmmov 0   ;;  %v292_v4 = vmov 0   ;;  %s382_s0 = inlined_call_operand.vmem [shape: bf16[8,32], index: 0, kind: input, shape index: {}]   ;;  %s383_s1 = inlined_call_operand.vmem [shape: bf16[8,32], index: 1, kind: input, shape index: {}]   ;;  %s384_s2 = inlined_call_operand.vmem [shape: s32[8,1], index: 2, kind: input, shape index: {}]   ;;  %s385_s3 = inlined_call_operand.vmem [shape: s32[1,8], index: 3, kind: input, shape index: {}]   ;;  %s386_s4 = inlined_call_operand.hbm [shape: f32[8,128], index: 4, kind: output, shape index: {}]  }
   0x1   :  { %v28_v0 = vld [vmem:[%s383_s1] sm:$0xf]  ;;  %246 = vmatprep.subr.bf16.mxu0 %v290_v1  ;;  %26 = vst [vmem:[#allocation4] sm:$0x1] %v290_v1  ;;  %248 = vmatprep.mubr.msk.bf16.mxu0 %vm291_vm1, %v290_v1 }
   0x2   :  { %v34_v2 = vsel %vm29_vm0, %v28_v0, 0  ;;  %v76_v3 = vld [vmem:[%s384_s2] sm:$0xff]  ;;  %258 = vset.pattern.permute.xlu0 %v292_v4 }
   0x3   :  { %247 = vmatpush3.bf16.xpose.msra.mxu0 %v34_v2 }
   0x4   :  { %9 = vsyncpa [#allocation6], 0  ;;  %85 = vperm.xlu0 %258, %v76_v3   ;;  %259 = vset.pattern.permute.xlu1 %v292_v4  ;;  %v27_v5 = vld [vmem:[%s382_s0] sm:$0xf]  ;;  %v79_v11 = vlaneseq  ;;  %vm293_vm4 = vmmov 1   ;;  %vm105_vm9 = vcmask 64512  }
   0x5   :  { %v243_v6 = vld [vmem:[%s385_s3] ss:$0 sm:$0xff]  ;;  %vm124_vm11 = vcmask 64519   ;;  %vm23_vm12 = vcmask 7168   ;;  %v294_v39 = vmov 1966171168  }
   0x6   :  { %v336_v16 = vand.u32 127, %v79_v11  ;;  %25 = vst.msk [vmem:[#allocation3] sm:$0xff] %vm23_vm12, %v290_v1  ;;  %24 = vst.msk [vmem:[#allocation2] sm:$0xff] %vm23_vm12, %v290_v1  ;;  %v152_v40 = vunpack.c.l.s4 %v294_v39  ;;  %v155_v45 = vshrl.u32 %v79_v11, 7  ;;  %s295_s0 = smov [#allocation5]  }
   0x7   :  { %s234_s2 = sshll.u32 %s295_s0, 4  ;;  %s235_s2 = int_to_ptr.vmem [resolvable:$true] %s234_s2 }
   0x8   :  { %vm83_vm3 = vcmp.lt.s32.totalorder %v336_v16, 8  ;;  %vm140_vm13 = vcmp.eq.s32.totalorder %v336_v16, 2  ;;  %vm142_vm15 = vcmp.eq.s32.totalorder %v336_v16, 3  ;;  %v153_v44 = vunpack.c.0.s8 %v152_v40  ;;  %v148_v3 = vld [vmem:[#allocation4] sm:$0x1]  ;;  %s266_s3 = scalar_lea.vmem %s235_s2, 128  ;;  %p271_p1 = scmp.lt.s32.totalorder %s235_s2, %s235_s2 }
   0x9   :  { %vm144_vm1 = vcmp.eq.s32.totalorder %v336_v16, 4  ;;  %v224_v17 = vsub.s32 0, %v155_v45  ;;  %p267_p0 = scmp.ne.s32.totalorder %s235_s2, %s266_s3  ;;  %p272_p2 = scmp.lt.s32.totalorder %s266_s3, %s266_s3 }
   0xa   :  { %249 = vmatmul.mubr.msk.bf16.vlgmr.msra.gmra.mrb[0].mxu0 %vm29_vm0, %v27_v5  ;;  %v156_v52 = vsub.s32 %v153_v44, %v155_v45 }
   0xb   :  { %p273_p3 = por %p272_p2, %p271_p1 }
   0xd   :  { %v112_v31 = vld [vmem:[#allocation3] sm:$0xff]  ;;  %v103_v32 = vld [vmem:[#allocation2] sm:$0xff]  ;;  %p274_p4 = pnand %p273_p3, %p267_p0 }
  0x83   :  { %v86_v7 = vpop.permute.xlu0 %85 }
  0x84   :  { %vm91_vm2 = vcmp.eq.s32.totalorder %v86_v7, %v243_v6 }
  0x85   :  { %vm97_vm5 = vmxor %vm91_vm2, %vm293_vm4 }
  0x86   :  { %vm94_vm6 = vmand %vm91_vm2, %vm83_vm3 }
  0x87   :  { %vm340_vm8 = vmand %vm97_vm5, %vm83_vm3  ;;  %vm207_vm3 = vcmp.eq.s32.totalorder %v336_v16, 0  ;;  %vm221_vm5 = vcmp.eq.s32.totalorder %v155_v45, 0 }
  0x88   :  { %v136_v29 = vsel %vm340_vm8, 1.0, %v290_v1 }
  0x89   :  { %v137_v30 = vsel %vm124_vm11, %v136_v29, 0.0 }
  0xdd   :  { %v70_v8 = vpop.f32.mrb[0].mxu0 }
  0xde   :  { %v99_v9 = vsub.f32 1.0, %v70_v8  ;;  %v250_v10 = vpop.f32.mrb[1].mxu0  ;;  %vm95_vm7 = vcmp.lt.f32.partialorder %v70_v8, 1.0  ;;  %v132_v27 = vsel %vm340_vm8, %v70_v8, 0.0 }
  0xdf   :  { %v73_v12 = vpop.f32.mrb[2].mxu0  ;;  %vm96_vm10 = vmand %vm94_vm6, %vm95_vm7  ;;  %v133_v28 = vsel %vm124_vm11, %v132_v27, 0.0 }
  0xe0   :  { %v100_v13 = vsel %vm91_vm2, %v99_v9, %v70_v8  ;;  %v251_v14 = vpop.f32.mrb[3].mxu0  ;;  %v123_v23 = vsel %vm96_vm10, %v70_v8, 0.0  ;;  %v128_v25 = vsel %vm96_vm10, 1.0, %v290_v1  ;;  %vm146_vm2 = vcmp.eq.s32.totalorder %v336_v16, 5 }
  0xe1   :  { %v101_v15 = vmul.f32 1.442695, %v100_v13  ;;  %v125_v24 = vsel %vm124_vm11, %v123_v23, 0.0  ;;  %v129_v26 = vsel %vm124_vm11, %v128_v25, 0.0 }
  0xe3   :  { %260 = vpow2.f32 %v101_v15 }
  0xed   :  { %v261_v18 = vpop.eup %260 }
  0xee   :  { %v113_v19 = vsel %vm340_vm8, %v261_v18, 0.0  ;;  %v104_v20 = vsel %vm96_vm10, %v261_v18, 0.0 }
  0xef   :  { %v114_v21 = vsel %vm105_vm9, %v113_v19, 0.0  ;;  %v106_v22 = vsel %vm105_vm9, %v104_v20, 0.0 }
  0xf0   :  { %115 = vadd.xlane.f32.xlu1 %v114_v21  ;;  %107 = vadd.xlane.f32.xlu0 %v106_v22 }
  0xf4   :  { %126 = vadd.xlane.f32.xlu1 %v125_v24 }
  0xf8   :  { %130 = vadd.xlane.f32.xlu1 %v129_v26 }
  0xfc   :  { %134 = vadd.xlane.f32.xlu1 %v133_v28 }
 0x100   :  { %138 = vadd.xlane.f32.xlu1 %v137_v30 }
 0x17d   :  { %v116_v33 = vpop.xlane.xlu1 %115  ;;  %v108_v34 = vpop.xlane.xlu0 %107 }
 0x17e   :  { %v117_v35 = vadd.f32 %v116_v33, %v112_v31  ;;  %v109_v36 = vadd.f32 %v108_v34, %v103_v32 }
 0x180   :  { %118 = vst.msk [vmem:[#allocation3] sm:$0xff] %vm23_vm12, %v117_v35  ;;  %111 = vst.msk [vmem:[#allocation2] sm:$0xff] %vm23_vm12, %v109_v36 }
 0x181   :  { %v127_v37 = vpop.xlane.xlu1 %126 }
 0x182   :  { %v141_v47 = vsel %vm140_vm13, %v127_v37, 0.0 }
 0x185   :  { %v131_v38 = vpop.xlane.xlu1 %130 }
 0x186   :  { %v143_v49 = vsel %vm142_vm15, %v131_v38, %v141_v47 }
 0x187   :  { %v174_v41 = vld [vmem:[#allocation3] sm:$0xff]  ;;  %v173_v42 = vld [vmem:[#allocation2] sm:$0xff] }
 0x188   :  { %vm181_vm14 = vcmp.gt.f32.partialorder %v174_v41, 0.0  ;;  %262 = vlog2.f32 %v174_v41 }
 0x189   :  { %v135_v43 = vpop.xlane.xlu1 %134  ;;  %vm196_vm0 = vmxor %vm181_vm14, %vm293_vm4  ;;  %264 = vlog2.f32 %v173_v42  ;;  %vm214_vm4 = vcmp.eq.s32.totalorder %v336_v16, 1 }
 0x18a   :  { %v198_v46 = vsel %vm196_vm0, 1.0, %v290_v1  ;;  %v145_v51 = vsel %vm144_vm1, %v135_v43, %v143_v49 }
 0x18b   :  { %v199_v48 = vsel %vm23_vm12, %v198_v46, 0.0 }
 0x18c   :  { %v200_v50 = vrot.slane %v199_v48, 4 }
 0x18d   :  { %v139_v53 = vpop.xlane.xlu1 %138 }
 0x18e   :  { %v147_v54 = vsel %vm146_vm2, %v139_v53, %v145_v51  ;;  %v201_v55 = vadd.f32 %v200_v50, %v199_v48 }
 0x18f   :  { %v150_v56 = vcombine.high %v147_v54, %v147_v54 }
 0x190   :  { %v202_v57 = vrot.slane %v201_v55, 2 }
 0x191   :  { %v157_v58 = vrot.slane %v150_v56, %v156_v52 }
 0x192   :  { %v263_v59 = vpop.eup %262  ;;  %v203_v60 = vadd.f32 %v202_v57, %v201_v55 }
 0x193   :  { %v265_v61 = vpop.eup %264  ;;  %v158_v62 = vcombine.high %v157_v58, %v157_v58  ;;  %v186_v63 = vmul.f32 0.6931472, %v263_v59 }
 0x194   :  { %v204_v0 = vrot.slane %v203_v60, 1  ;;  %v184_v1 = vmul.f32 0.6931472, %v265_v61 }
 0x195   :  { %v165_v2 = vrot.slane %v158_v62, %v156_v52 }
 0x196   :  { %v205_v4 = vadd.f32 %v204_v0, %v203_v60  ;;  %v187_v5 = vadd.f32 %v186_v63, %v184_v1 }
 0x197   :  { %v166_v6 = vcombine.high %v165_v2, %v165_v2 }
 0x198   :  { %217 = vperm.xlu0 %258, %v205_v4   ;;  %v188_v7 = vsel %vm181_vm14, %v187_v5, 0.0 }
 0x199   :  { %v168_v8 = vadd.f32 %v166_v6, %v148_v3  ;;  %v189_v9 = vsel %vm23_vm12, %v188_v7, 0.0 }
 0x19a   :  { %v190_v10 = vrot.slane %v189_v9, 4 }
 0x19b   :  { %169 = vst [vmem:[#allocation4] sm:$0x1] %v168_v8 }
 0x19c   :  { %v191_v11 = vadd.f32 %v190_v10, %v189_v9 }
 0x19e   :  { %v192_v12 = vrot.slane %v191_v11, 2 }
 0x1a0   :  { %v193_v13 = vadd.f32 %v192_v12, %v191_v11 }
 0x1a2   :  { %v194_v14 = vrot.slane %v193_v13, 1  ;;  %v206_v18 = vld [vmem:[#allocation4] sm:$0x1] }
 0x1a4   :  { %v195_v15 = vadd.f32 %v194_v14, %v193_v13 }
 0x1a6   :  { %210 = vperm.xlu1 %259, %v195_v15  }
 0x217   :  { %v218_v20 = vpop.permute.xlu0 %217 }
 0x225   :  { %v211_v19 = vpop.permute.xlu1 %210 }
 0x226   :  { %v213_v21 = vsel %vm207_vm3, %v211_v19, %v206_v18 }
 0x227   :  { %v220_v22 = vsel %vm214_vm4, %v218_v20, %v213_v21 }
 0x228   :  { %v225_v23 = vrot.slane %v220_v22, %v224_v17 }
 0x22a   :  { %v226_v24 = vsel %vm221_vm5, %v225_v23, 0.0 }
 0x22b   :  { %227 = vst [vmem:[#allocation5] sm:$0xff] %v226_v24 }
 0x22c   :  { %277 = shalt.err (!%p274_p4)
}
 0x22d   :  { %s278_s24 = scalar_lea.hbm %s386_s4, 128 }
 0x22e   :  { %p279_p5 = scmp.ne.s32.totalorder %s386_s4, %s278_s24  ;;  %p282_p6 = scmp.lt.u32.totalorder %s278_s24, %s386_s4 }
 0x230   :  { %p284_p7 = pnand %p282_p6, %p279_p5 }
 0x232   :  { %287 = shalt.err (!%p284_p7)
}
 0x233   :  { %237 = dma.vmem_to_hbm [thread:$0]  %s235_s2, 128, %s386_s4, [#allocation6]  }
 0x234   :  { %288 = dma.done.wait [#allocation6], 128  }
 0x235   :  { %289 = vsyncadd [#allocation6], 4294967168 }
 0x236   :  { %241 = vsyncpa [#allocation6], 1 }

</bundles_post_ra>
